<compile_context>
chip_gen: v6e
topology: v6e:2x2x1
jax: 0.10.0
libtpu: 0.0.40
codegen_flags: <defaults>
</compile_context>

<pallas_src>
import functools

import jax
import jax.numpy as jnp
from jax.experimental import pallas as pl
from jax.experimental.pallas import tpu as pltpu

_LANES = 128
# Padded-f32 element budget per block-sized buffer.  4 MiB each:
#   2 f32 accumulators (8 MiB) + 2 inputs x 2 pipeline buffers (<= 16 MiB)
# ~= 24 MiB total, comfortably inside every generation's VMEM.
_MAX_BLOCK_F32_ELEMS = 1 << 20
_VMEM_LIMIT = 48 * 1024 * 1024  # safe on v7x's 64 MiB/TC, generous on v5e/v6e


def _round_up(x, m):
    return ((x + m - 1) // m) * m


def _sublane_pack(dtype):
    # vreg sublane packing: f32 -> 8, bf16/f16 -> 16, int8/fp8 -> 32.
    return max(8, 32 // jnp.dtype(dtype).itemsize)


def _dice_kernel(pred_ref, targ_ref, loss_ref, num_acc, den_acc, *,
                 smooth, p, d, cols):
    """One (b_tile, cols) chunk of a batch tile.

    grid = (batch_blocks, feature_chunks).  Axis 0 is "parallel" (megacore
    sharding on v7x), axis 1 is the "arbitrary" streaming reduction.  The
    accumulators are full-width f32 vregs (pure VPU adds per chunk); the
    per-sample cross-lane reduce runs only once, in the last-chunk epilogue.
    """
    k = pl.program_id(1)
    last = pl.num_programs(1) - 1

    @pl.when(k == 0)
    def _():
        num_acc[...] = jnp.zeros_like(num_acc)
        den_acc[...] = jnp.zeros_like(den_acc)

    def accumulate(mask_tail):
        pr = pred_ref[...].astype(jnp.float32)   # (b_tile, cols)
        tg = targ_ref[...].astype(jnp.float32)
        if mask_tail:
            # Only the last chunk can overhang D; zero the overhang lanes
            # (neutral for both sums since p > 0).
            col_ids = jax.lax.broadcasted_iota(jnp.int32, pr.shape, 1)
            valid = (k * cols + col_ids) < d
            pr = jnp.where(valid, pr, 0.0)
            tg = jnp.where(valid, tg, 0.0)
        if p == 2:
            den_term = pr * pr + tg * tg          # explicit VPU multiplies
        elif p == 1:
            den_term = pr + tg
        else:
            den_term = pr ** p + tg ** p
        num_acc[...] += pr * tg
        den_acc[...] += den_term

    if d % cols != 0:
        # Keep the masking completely off the common path.
        @pl.when(k != last)
        def _():
            accumulate(False)

        @pl.when(k == last)
        def _():
            accumulate(True)
    else:
        accumulate(False)

    @pl.when(k == last)
    def _():
        num = jnp.sum(num_acc[...], axis=1, keepdims=True) + jnp.float32(smooth)
        den = jnp.sum(den_acc[...], axis=1, keepdims=True) + jnp.float32(smooth)
        loss_ref[...] = 1.0 - num / den


def binary_dice_loss(predict, target, *, smooth=1.0, p=2, reduction="mean",
                     max_block_elems=_MAX_BLOCK_F32_ELEMS):
    """Pallas implementation of BinaryDiceLoss.forward."""
    assert predict.shape[0] == target.shape[0], \
        "predict & target batch size don't match"
    # Zero-filled overhang lanes are only neutral in the denominator for p > 0
    # (same implicit post-sigmoid / non-negative assumption as the reference).
    assert p > 0, "binary_dice_loss kernel assumes p > 0"

    n = predict.shape[0]
    pred2d = predict.reshape(n, -1)   # views only: no padded HBM copies
    targ2d = target.reshape(n, -1)
    d = pred2d.shape[1]

    pack = max(_sublane_pack(pred2d.dtype), _sublane_pack(targ2d.dtype))
    d_lanes = _round_up(d, _LANES)

    # ---- Tiling ------------------------------------------------------------
    if d_lanes * pack <= max_block_elems:
        # Small / medium feature dim: one chunk covers all of D (cols == full
        # dim -> no tail masking), and the batch is tiled so many samples
        # share a grid step.
        cols = d
        rows_fit = max_block_elems // d_lanes
        if rows_fit >= n:
            b_tile = n
        else:
            b_tile = (rows_fit // pack) * pack     # multiple of pack >= 8
    else:
        # Large feature dim: a handful of samples per block, features streamed
        # in lane-dense chunks of `cols` (multiple of 128); a ragged last
        # chunk is masked in-kernel.
        b_tile = n if n <= pack else pack
        padded_rows = _round_up(b_tile, 8)
        cols = max(_LANES,
                   (max_block_elems // (padded_rows * _LANES)) * _LANES)
        if cols >= d_lanes:
            cols = d                               # single full-width chunk

    k_steps = pl.cdiv(d, cols)
    n_steps = pl.cdiv(n, b_tile)

    kernel = functools.partial(_dice_kernel, smooth=float(smooth), p=p,
                               d=d, cols=cols)

    cost = pl.CostEstimate(
        flops=6 * n * d,
        transcendentals=0,
        bytes_accessed=n * d * (pred2d.dtype.itemsize + targ2d.dtype.itemsize)
        + n * 4,
    )

    # TODO(synk): for N == 1 on v7x, additionally split the K reduction across
    # the two TensorCores (partial num/den outputs combined in the wrapper).
    per_sample = pl.pallas_call(
        kernel,
        out_shape=jax.ShapeDtypeStruct((n, 1), jnp.float32),
        grid_spec=pltpu.PrefetchScalarGridSpec(
            num_scalar_prefetch=0,
            grid=(n_steps, k_steps),
            in_specs=[
                pl.BlockSpec((b_tile, cols), lambda i, k: (i, k)),
                pl.BlockSpec((b_tile, cols), lambda i, k: (i, k)),
            ],
            out_specs=pl.BlockSpec((b_tile, 1), lambda i, k: (i, 0)),
            scratch_shapes=[
                pltpu.VMEM((b_tile, cols), jnp.float32),   # running sum(p*t)
                pltpu.VMEM((b_tile, cols), jnp.float32),   # running sum(p^p+t^p)
            ],
        ),
        compiler_params=pltpu.CompilerParams(
            dimension_semantics=("parallel", "arbitrary"),
            vmem_limit_bytes=_VMEM_LIMIT,
        ),
        cost_estimate=cost,
    )(pred2d, targ2d)

    loss = per_sample[:, 0]  # shape [N,]
    if reduction == "mean":
        return jnp.mean(loss)
    elif reduction == "sum":
        return jnp.sum(loss)
    elif reduction == "none":
        return loss
    else:
        raise Exception("Unexpected reduction {}".format(reduction))


def _reference(predict, target, smooth=1.0, p=2, reduction="mean"):
    n = predict.shape[0]
    pr = predict.reshape(n, -1).astype(jnp.float32)
    tg = target.reshape(n, -1).astype(jnp.float32)
    num = jnp.sum(pr * tg, axis=1) + smooth
    den = jnp.sum(pr ** p + tg ** p, axis=1) + smooth
    loss = 1.0 - num / den
    if reduction == "mean":
        return loss.mean()
    if reduction == "sum":
        return loss.sum()
    return loss


if __name__ == "__main__":
    key = jax.random.PRNGKey(0)
    k1, k2, k3, k4, k5, k6, k7, k8 = jax.random.split(key, 8)

    # Main case: [N, C, H, W] = [2, 4, 16, 16] binary segmentation head.
    # D = 1024 (lane aligned) -> single chunk, batch-tiled grid (1, 1).
    predict = jax.nn.sigmoid(jax.random.normal(k1, (2, 4, 16, 16), jnp.float32))
    target = (jax.random.uniform(k2, (2, 4, 16, 16)) > 0.5).astype(jnp.float32)
    out = binary_dice_loss(predict, target, smooth=1.0, p=2, reduction="mean")
    out = jax.block_until_ready(out)
    ref = _reference(predict, target, 1.0, 2, "mean")
    assert jnp.allclose(out, ref, atol=1e-5, rtol=1e-5), (out, ref)

    # Multi-chunk streaming with a non-128-aligned, in-kernel-masked tail:
    # D = 3*20*21 = 1260, forced small block budget -> cols = 512, 3 chunks.
    predict2 = jax.nn.sigmoid(jax.random.normal(k3, (2, 3, 20, 21), jnp.float32))
    target2 = (jax.random.uniform(k4, (2, 3, 20, 21)) > 0.5).astype(jnp.float32)
    out2 = binary_dice_loss(predict2, target2, smooth=1.0, p=2,
                            reduction="none", max_block_elems=4096)
    out2 = jax.block_until_ready(out2)
    ref2 = _reference(predict2, target2, 1.0, 2, "none")
    assert jnp.allclose(out2, ref2, atol=1e-5, rtol=1e-5), (out2, ref2)

    # Ragged batch tiling: N = 10 with an 8-sample batch tile (grid (2, 1)).
    predict3 = jax.nn.sigmoid(jax.random.normal(k5, (10, 256), jnp.float32))
    target3 = (jax.random.uniform(k6, (10, 256)) > 0.5).astype(jnp.float32)
    out3 = binary_dice_loss(predict3, target3, smooth=1.0, p=2,
                            reduction="sum", max_block_elems=2048)
    out3 = jax.block_until_ready(out3)
    ref3 = _reference(predict3, target3, 1.0, 2, "sum")
    assert jnp.allclose(out3, ref3, atol=1e-5, rtol=1e-5), (out3, ref3)

    # bf16 inputs, non-128-aligned D handled as a single full-width chunk.
    predict4 = jax.nn.sigmoid(
        jax.random.normal(k7, (2, 4, 16, 17), jnp.float32)).astype(jnp.bfloat16)
    target4 = (jax.random.uniform(k8, (2, 4, 16, 17)) > 0.5).astype(jnp.bfloat16)
    out4 = binary_dice_loss(predict4, target4, smooth=1.0, p=2, reduction="none")
    out4 = jax.block_until_ready(out4)
    ref4 = _reference(predict4, target4, 1.0, 2, "none")
    assert jnp.allclose(out4, ref4, atol=1e-5, rtol=1e-5), (out4, ref4)

    print("KERNEL_OK")
</pallas_src>

<mosaic_0001>
module attributes {stable_mosaic.version = 11 : i64} {
  func.func @_dice_kernel(%arg0: i32, %arg1: i32, %arg2: memref<2x1024xf32, #tpu.memory_space<vmem>>, %arg3: memref<2x1024xf32, #tpu.memory_space<vmem>>, %arg4: memref<2x1xf32, #tpu.memory_space<vmem>>, %arg5: memref<2x1024xf32, #tpu.memory_space<vmem>>, %arg6: memref<2x1024xf32, #tpu.memory_space<vmem>>) attributes {dimension_semantics = [#tpu.dimension_semantics<parallel>, #tpu.dimension_semantics<arbitrary>], iteration_bounds = array<i64: 1, 1>, scalar_prefetch = 0 : i64, scratch_operands = 2 : i64, tpu.core_type = #tpu.core_type<tc>, window_params = [{transform_indices = @transform_0, window_bounds = array<i64: 2, 1024>}, {transform_indices = @transform_1, window_bounds = array<i64: 2, 1024>}, {transform_indices = @transform_2, window_bounds = array<i64: 2, 1>}]} {
    %c0_i32 = arith.constant 0 : i32
    %0 = arith.cmpi eq, %arg1, %c0_i32 : i32
    %1 = arith.extui %0 : i1 to i32
    %c0_i32_0 = arith.constant 0 : i32
    %2 = arith.cmpi ne, %1, %c0_i32_0 : i32
    scf.if %2 {
      %cst = arith.constant 0.000000e+00 : f32
      %18 = vector.broadcast %cst : f32 to vector<2x1024xf32>
      %c0_14 = arith.constant 0 : index
      %c0_15 = arith.constant 0 : index
      %19 = vector.load %arg5[%c0_14, %c0_15] : memref<2x1024xf32, #tpu.memory_space<vmem>>, vector<2x1024xf32>
      tpu.vector_store %arg5[%c0_14, %c0_15], %18 {strides = array<i32>} : memref<2x1024xf32, #tpu.memory_space<vmem>>, vector<2x1024xf32>,
      %cst_16 = arith.constant 0.000000e+00 : f32
      %20 = vector.broadcast %cst_16 : f32 to vector<2x1024xf32>
      %c0_17 = arith.constant 0 : index
      %c0_18 = arith.constant 0 : index
      %21 = vector.load %arg6[%c0_17, %c0_18] : memref<2x1024xf32, #tpu.memory_space<vmem>>, vector<2x1024xf32>
      tpu.vector_store %arg6[%c0_17, %c0_18], %20 {strides = array<i32>} : memref<2x1024xf32, #tpu.memory_space<vmem>>, vector<2x1024xf32>,
    } else {
    }
    %c0 = arith.constant 0 : index
    %c0_1 = arith.constant 0 : index
    %3 = vector.load %arg2[%c0, %c0_1] : memref<2x1024xf32, #tpu.memory_space<vmem>>, vector<2x1024xf32>
    %c0_2 = arith.constant 0 : index
    %c0_3 = arith.constant 0 : index
    %4 = vector.load %arg3[%c0_2, %c0_3] : memref<2x1024xf32, #tpu.memory_space<vmem>>, vector<2x1024xf32>
    %5 = arith.mulf %3, %3 : vector<2x1024xf32>
    %6 = arith.mulf %4, %4 : vector<2x1024xf32>
    %7 = arith.addf %5, %6 : vector<2x1024xf32>
    %c0_4 = arith.constant 0 : index
    %c0_5 = arith.constant 0 : index
    %8 = vector.load %arg5[%c0_4, %c0_5] : memref<2x1024xf32, #tpu.memory_space<vmem>>, vector<2x1024xf32>
    %9 = arith.mulf %3, %4 : vector<2x1024xf32>
    %10 = arith.addf %8, %9 : vector<2x1024xf32>
    %c0_6 = arith.constant 0 : index
    %c0_7 = arith.constant 0 : index
    %11 = vector.load %arg5[%c0_6, %c0_7] : memref<2x1024xf32, #tpu.memory_space<vmem>>, vector<2x1024xf32>
    tpu.vector_store %arg5[%c0_6, %c0_7], %10 {strides = array<i32>} : memref<2x1024xf32, #tpu.memory_space<vmem>>, vector<2x1024xf32>,
    %c0_8 = arith.constant 0 : index
    %c0_9 = arith.constant 0 : index
    %12 = vector.load %arg6[%c0_8, %c0_9] : memref<2x1024xf32, #tpu.memory_space<vmem>>, vector<2x1024xf32>
    %13 = arith.addf %12, %7 : vector<2x1024xf32>
    %c0_10 = arith.constant 0 : index
    %c0_11 = arith.constant 0 : index
    %14 = vector.load %arg6[%c0_10, %c0_11] : memref<2x1024xf32, #tpu.memory_space<vmem>>, vector<2x1024xf32>
    tpu.vector_store %arg6[%c0_10, %c0_11], %13 {strides = array<i32>} : memref<2x1024xf32, #tpu.memory_space<vmem>>, vector<2x1024xf32>,
    %c0_i32_12 = arith.constant 0 : i32
    %15 = arith.cmpi eq, %arg1, %c0_i32_12 : i32
    %16 = arith.extui %15 : i1 to i32
    %c0_i32_13 = arith.constant 0 : i32
    %17 = arith.cmpi ne, %16, %c0_i32_13 : i32
    scf.if %17 {
      %c0_14 = arith.constant 0 : index
      %c0_15 = arith.constant 0 : index
      %18 = vector.load %arg5[%c0_14, %c0_15] : memref<2x1024xf32, #tpu.memory_space<vmem>>, vector<2x1024xf32>
      %cst = arith.constant dense<0.000000e+00> : vector<2xf32>
      %19 = vector.multi_reduction <add>, %18, %cst [1] : vector<2x1024xf32> to vector<2xf32>
      %20 = vector.shape_cast %19 : vector<2xf32> to vector<2x1xf32>
      %cst_16 = arith.constant 1.000000e+00 : f32
      %21 = vector.broadcast %cst_16 : f32 to vector<2x1xf32>
      %22 = arith.addf %20, %21 : vector<2x1xf32>
      %c0_17 = arith.constant 0 : index
      %c0_18 = arith.constant 0 : index
      %23 = vector.load %arg6[%c0_17, %c0_18] : memref<2x1024xf32, #tpu.memory_space<vmem>>, vector<2x1024xf32>
      %cst_19 = arith.constant dense<0.000000e+00> : vector<2xf32>
      %24 = vector.multi_reduction <add>, %23, %cst_19 [1] : vector<2x1024xf32> to vector<2xf32>
      %25 = vector.shape_cast %24 : vector<2xf32> to vector<2x1xf32>
      %cst_20 = arith.constant 1.000000e+00 : f32
      %26 = vector.broadcast %cst_20 : f32 to vector<2x1xf32>
      %27 = arith.addf %25, %26 : vector<2x1xf32>
      %28 = arith.divf %22, %27 : vector<2x1xf32>
      %cst_21 = arith.constant 1.000000e+00 : f32
      %29 = vector.broadcast %cst_21 : f32 to vector<2x1xf32>
      %30 = arith.subf %29, %28 : vector<2x1xf32>
      %c0_22 = arith.constant 0 : index
      %c0_23 = arith.constant 0 : index
      %31 = vector.load %arg4[%c0_22, %c0_23] : memref<2x1xf32, #tpu.memory_space<vmem>>, vector<2x1xf32>
      tpu.vector_store %arg4[%c0_22, %c0_23], %30 {strides = array<i32>} : memref<2x1xf32, #tpu.memory_space<vmem>>, vector<2x1xf32>,
    } else {
    }
    return
  }
  func.func @transform_0(%arg0: i32, %arg1: i32) -> (i32, i32) {
    %c0_i32 = arith.constant 0 : i32
    return %arg0, %arg1 : i32, i32
  }
  func.func @transform_1(%arg0: i32, %arg1: i32) -> (i32, i32) {
    %c0_i32 = arith.constant 0 : i32
    return %arg0, %arg1 : i32, i32
  }
  func.func @transform_2(%arg0: i32, %arg1: i32) -> (i32, i32) {
    %c0_i32 = arith.constant 0 : i32
    %c0_i32_0 = arith.constant 0 : i32
    return %arg0, %c0_i32 : i32, i32
  }
}

</mosaic_0001>

<bundles_post_ra>
// kernel: tpu_custom_call.1
= control target key start
LH: loop header
LB: loop body
LE: loop exit
PB: predicated region body
PF: predicated region fallthrough
CT: control target
= control target key end

     0   :  { %7 = vsyncpa [#allocation5], 0  ;;  %s302_s0 = inlined_call_operand.hbm [shape: f32[2,1024], index: 0, kind: input, shape index: {}]   ;;  %s303_s1 = inlined_call_operand.hbm [shape: f32[2,1024], index: 1, kind: input, shape index: {}]   ;;  %s304_s2 = inlined_call_operand.vmem [shape: f32[2,1], index: 2, kind: output, shape index: {}]  }
   0x1   :  { %8 = vsyncpa [#allocation7], 0  ;;  %s259_s9 = smov [#allocation4]   ;;  %s260_s11 = smov [#allocation6]  }
   0x2   :  { %s15_s10 = sshll.u32 %s259_s9, 4  ;;  %s25_s12 = sshll.u32 %s260_s11, 4  ;;  %s16_s10 = int_to_ptr.vmem [resolvable:$true] %s15_s10  ;;  %s26_s12 = int_to_ptr.vmem [resolvable:$true] %s25_s12 }
   0x3   :  { %s223_s13 = scalar_lea.vmem %s16_s10, 256  ;;  %p228_p1 = scmp.lt.s32.totalorder %s16_s10, %s16_s10 }
   0x4   :  { %p224_p0 = scmp.ne.s32.totalorder %s16_s10, %s223_s13  ;;  %p229_p2 = scmp.lt.s32.totalorder %s223_s13, %s223_s13 }
   0x6   :  { %p230_p3 = por %p229_p2, %p228_p1 }
   0x8   :  { %p231_p4 = pnand %p230_p3, %p224_p0 }
   0xa   :  { %234 = shalt.err (!%p231_p4)
}
   0xb   :  { %18 = dma.hbm_to_vmem [thread:$0]  %s302_s0, 256, %s16_s10, [#allocation5]  }
   0xc   :  { %s243_s16 = scalar_lea.vmem %s26_s12, 256  ;;  %p248_p6 = scmp.lt.s32.totalorder %s26_s12, %s26_s12 }
   0xd   :  { %p244_p5 = scmp.ne.s32.totalorder %s26_s12, %s243_s16  ;;  %p249_p7 = scmp.lt.s32.totalorder %s243_s16, %s243_s16 }
   0xf   :  { %p250_p8 = por %p249_p7, %p248_p6 }
  0x11   :  { %p251_p9 = pnand %p250_p8, %p244_p5 }
  0x13   :  { %254 = shalt.err (!%p251_p9)
}
  0x14   :  { %28 = dma.hbm_to_vmem [thread:$0]  %s303_s1, 256, %s26_s12, [#allocation7]  }
  0x15   :  { %255 = dma.done.wait [#allocation5], 256  }
  0x16   :  { %256 = vsyncadd [#allocation5], 4294967040 }
  0x17   :  { %257 = dma.done.wait [#allocation7], 256  }
  0x18   :  { %258 = vsyncadd [#allocation7], 4294967040  ;;  %v78_v0 = vlaneseq  ;;  %v261_v1 = vmov 1983009808   ;;  %v43_v5 = vld [vmem:[#allocation4] sm:$0xff]  ;;  %v44_v6 = vld [vmem:[#allocation4 + $0x8] sm:$0xff] }
  0x19   :  { %v76_v2 = vunpack.c.l.s4 %v261_v1  ;;  %v45_v7 = vld [vmem:[#allocation6] sm:$0xff]  ;;  %v46_v9 = vld [vmem:[#allocation6 + $0x8] sm:$0xff]  ;;  %v47_v10 = vmul.f32 %v43_v5, %v43_v5  ;;  %v48_v11 = vmul.f32 %v44_v6, %v44_v6  ;;  %vm116_vm0 = vcmask 1041408  }
  0x1a   :  { %v79_v4 = vshrl.u32 %v78_v0, 7  ;;  %v49_v12 = vmul.f32 %v45_v7, %v45_v7  ;;  %v55_v13 = vmul.f32 %v45_v7, %v43_v5  ;;  %v50_v14 = vmul.f32 %v46_v9, %v46_v9 }
  0x1b   :  { %v77_v3 = vunpack.c.0.s8 %v76_v2  ;;  %v56_v19 = vmul.f32 %v46_v9, %v44_v6  ;;  %vm202_vm1 = vcmask 1024  }
  0x1c   :  { %v51_v15 = vadd.f32 %v49_v12, %v47_v10  ;;  %v74_v16 = vcombine.high %v55_v13, %v55_v13  ;;  %v52_v18 = vadd.f32 %v50_v14, %v48_v11 }
  0x1d   :  { %v80_v8 = vsub.s32 %v77_v3, %v79_v4  ;;  %v91_v30 = vcombine.high %v56_v19, %v56_v19 }
  0x1e   :  { %v139_v20 = vcombine.high %v51_v15, %v51_v15  ;;  %v156_v23 = vcombine.high %v52_v18, %v52_v18 }
  0x1f   :  { %v81_v17 = vrot.slane %v55_v13, %v80_v8  ;;  %v146_v21 = vrot.slane %v51_v15, %v80_v8  ;;  %v88_v22 = vrot.slane %v74_v16, %v80_v8  ;;  %v163_v27 = vrot.slane %v52_v18, %v80_v8 }
  0x20   :  { %v153_v25 = vrot.slane %v139_v20, %v80_v8  ;;  %v98_v31 = vrot.slane %v56_v19, %v80_v8  ;;  %v170_v36 = vrot.slane %v156_v23, %v80_v8  ;;  %v105_v45 = vrot.slane %v91_v30, %v80_v8 }
  0x21   :  { %v89_v24 = vcombine.high %v81_v17, %v81_v17  ;;  %v154_v26 = vcombine.high %v146_v21, %v146_v21  ;;  %v181_v28 = vsel %vm116_vm0, %v146_v21, 0.0  ;;  %v90_v29 = vcombine.high %v88_v22, %v88_v22 }
  0x22   :  { %v155_v32 = vcombine.high %v153_v25, %v153_v25  ;;  %v184_v34 = vsel %vm116_vm0, %v153_v25, 0.0  ;;  %v117_v35 = vsel %vm116_vm0, %v81_v17, 0.0  ;;  %v171_v38 = vcombine.high %v163_v27, %v163_v27 }
  0x23   :  { %v182_v33 = vsel %vm116_vm0, %v154_v26, 0.0  ;;  %v118_v40 = vsel %vm116_vm0, %v89_v24, 0.0  ;;  %v120_v41 = vsel %vm116_vm0, %v88_v22, 0.0  ;;  %v188_v44 = vsel %vm116_vm0, %v163_v27, 0.0 }
  0x24   :  { %v183_v37 = vadd.f32 %v182_v33, %v181_v28  ;;  %v186_v39 = vsel %vm116_vm0, %v155_v32, 0.0  ;;  %v119_v43 = vadd.f32 %v118_v40, %v117_v35  ;;  %v106_v46 = vcombine.high %v98_v31, %v98_v31 }
  0x25   :  { %v122_v47 = vsel %vm116_vm0, %v90_v29, 0.0  ;;  %v172_v50 = vcombine.high %v170_v36, %v170_v36  ;;  %v190_v51 = vsel %vm116_vm0, %v171_v38, 0.0  ;;  %v124_v52 = vsel %vm116_vm0, %v98_v31, 0.0 }
  0x26   :  { %v185_v42 = vadd.f32 %v184_v34, %v183_v37  ;;  %v121_v49 = vadd.f32 %v120_v41, %v119_v43  ;;  %v192_v55 = vsel %vm116_vm0, %v170_v36, 0.0  ;;  %v107_v56 = vcombine.high %v105_v45, %v105_v45 }
  0x27   :  { %v126_v57 = vsel %vm116_vm0, %v106_v46, 0.0  ;;  %v194_v60 = vsel %vm116_vm0, %v172_v50, 0.0  ;;  %v128_v61 = vsel %vm116_vm0, %v105_v45, 0.0 }
  0x28   :  { %v187_v48 = vadd.f32 %v186_v39, %v185_v42  ;;  %v123_v54 = vadd.f32 %v122_v47, %v121_v49  ;;  %v130_v0 = vsel %vm116_vm0, %v107_v56, 0.0 }
  0x2a   :  { %v189_v53 = vadd.f32 %v188_v44, %v187_v48  ;;  %v125_v59 = vadd.f32 %v124_v52, %v123_v54 }
  0x2c   :  { %v191_v58 = vadd.f32 %v190_v51, %v189_v53  ;;  %v127_v63 = vadd.f32 %v126_v57, %v125_v59 }
  0x2e   :  { %v193_v62 = vadd.f32 %v192_v55, %v191_v58  ;;  %v129_v2 = vadd.f32 %v128_v61, %v127_v63 }
  0x30   :  { %v195_v1 = vadd.f32 %v194_v60, %v193_v62  ;;  %v131_v3 = vadd.f32 %v130_v0, %v129_v2 }
  0x32   :  { %196 = vadd.xlane.f32.xlu0 %v195_v1 }
  0x36   :  { %132 = vadd.xlane.f32.xlu0 %v131_v3 }
  0xbb   :  { %v197_v4 = vpop.xlane.xlu0 %196 }
  0xbc   :  { %v198_v5 = vadd.f32 1.0, %v197_v4 }
  0xbe   :  { %213 = vrcp.f32 %v198_v5 }
  0xbf   :  { %v133_v6 = vpop.xlane.xlu0 %132 }
  0xc0   :  { %v134_v7 = vadd.f32 1.0, %v133_v6 }
  0xcb   :  { %v214_v8 = vpop.eup %213 }
  0xcc   :  { %v200_v9 = vmul.f32 %v214_v8, %v134_v7 }
  0xce   :  { %v201_v10 = vsub.f32 1.0, %v200_v9 }
  0xd0   :  { %203 = vst.msk [vmem:[%s304_s2] sm:$0x3] %vm202_vm1, %v201_v10 }
  0xd1   :  { %208 = vsyncpa [#allocation5], 1 }
  0xd2   :  { %209 = vsyncpa [#allocation7], 1 }

</bundles_post_ra>
